<compile_context>
chip_gen: v5e
topology: v5e:2x2
jax: 0.10.0
libtpu: 0.0.40
codegen_flags: <defaults>
</compile_context>

<pallas_src>
import functools
import math

import jax
import jax.numpy as jnp
from jax.experimental import pallas as pl
from jax.experimental.pallas import tpu as pltpu

LANE = 128


def _round_up(x, m):
    return ((x + m - 1) // m) * m


def _nbeats_block_kernel(*refs, num_linear_layers):
    """refs = (x, w1^T, b1, ..., wN^T, bN, wb^T, bb, theta_out).

    x:       (TM, S_pad)       bf16 tile of the flattened (batch*dim) rows
    w_i^T:   (in_pad, out_pad) bf16, pre-transposed + lane-padded in the wrapper
    b_i:     (1, out_pad)      f32
    theta:   (TM, T_pad)       single lane-dense output tile (caller dtype)
    """
    x_ref = refs[0]
    theta_ref = refs[-1]

    h = x_ref[...]                                   # bf16
    idx = 1
    for _ in range(num_linear_layers):
        w_ref, b_ref = refs[idx], refs[idx + 1]
        idx += 2
        a = jnp.dot(h, w_ref[...], preferred_element_type=jnp.float32) + b_ref[...]
        h = jnp.maximum(a, 0.0).astype(jnp.bfloat16)  # bf16 feed for the next MXU op
    wb_ref, bb_ref = refs[idx], refs[idx + 1]
    theta = jnp.dot(h, wb_ref[...], preferred_element_type=jnp.float32) + bb_ref[...]
    theta_ref[...] = theta.astype(theta_ref.dtype)


def _const_spec(shape):
    n = len(shape)
    return pl.BlockSpec(shape, lambda i, _n=n: (0,) * _n)


def nbeats_block(x, layer_params, basis_w, basis_b, *,
                 backcast_size, forecast_size, block_m=512,
                 vmem_limit_bytes=None):
    """Forward of NBeatsBlock with GenericBasis.

    x: (..., S); Linear layers act on the last axis, as in the PyTorch module.
    Parameters are in PyTorch orientation: w (out, in), b (out,).
    """
    orig_dtype = x.dtype
    S = x.shape[-1]
    lead = x.shape[:-1]
    M = math.prod(lead) if lead else 1
    theta_size = basis_w.shape[0]
    assert theta_size == backcast_size + forecast_size

    # ---- lane-align feature dims (zero padding is exact through Linear+ReLU) ----
    S_pad = _round_up(S, LANE)
    T_pad = _round_up(theta_size, LANE)

    # ---- row tiling: mult. of 16 (bf16 sublanes), >=2 grid steps when possible ----
    TM = max(16, min(block_m, _round_up(-(-M // 2), 16)))
    Mp = _round_up(M, TM)

    # ---- single fused reshape -> bf16 cast -> pad pass over x ----
    x2 = jnp.pad(x.reshape(M, S).astype(jnp.bfloat16),
                 ((0, Mp - M), (0, S_pad - S)))

    flat_params = []
    in_specs = [pl.BlockSpec((TM, S_pad), lambda i: (i, 0))]
    flops = 0
    in_f_pad = S_pad
    for w, b in layer_params:
        out_f, in_f = w.shape
        out_pad = _round_up(out_f, LANE)
        wt = jnp.pad(jnp.asarray(w, jnp.bfloat16).T,
                     ((0, in_f_pad - in_f), (0, out_pad - out_f)))
        b2 = jnp.pad(jnp.asarray(b, jnp.float32).reshape(1, -1),
                     ((0, 0), (0, out_pad - out_f)))
        flat_params += [wt, b2]
        in_specs += [_const_spec(wt.shape), _const_spec(b2.shape)]
        flops += 2 * Mp * in_f_pad * out_pad
        in_f_pad = out_pad
    wbt = jnp.pad(jnp.asarray(basis_w, jnp.bfloat16).T,
                  ((0, in_f_pad - basis_w.shape[1]), (0, T_pad - theta_size)))
    bb2 = jnp.pad(jnp.asarray(basis_b, jnp.float32).reshape(1, -1),
                  ((0, 0), (0, T_pad - theta_size)))
    flat_params += [wbt, bb2]
    in_specs += [_const_spec(wbt.shape), _const_spec(bb2.shape)]
    flops += 2 * Mp * in_f_pad * T_pad

    bytes_accessed = (
        Mp * S_pad * 2
        + sum(math.prod(p.shape) * p.dtype.itemsize for p in flat_params)
        + Mp * T_pad * jnp.dtype(orig_dtype).itemsize)

    kernel = functools.partial(_nbeats_block_kernel,
                               num_linear_layers=len(layer_params))

    cp_kwargs = dict(dimension_semantics=("parallel",))
    if vmem_limit_bytes is not None:
        cp_kwargs["vmem_limit_bytes"] = vmem_limit_bytes

    theta = pl.pallas_call(
        kernel,
        out_shape=jax.ShapeDtypeStruct((Mp, T_pad), orig_dtype),
        grid_spec=pltpu.PrefetchScalarGridSpec(
            num_scalar_prefetch=0,
            grid=(Mp // TM,),
            in_specs=in_specs,
            out_specs=pl.BlockSpec((TM, T_pad), lambda i: (i, 0)),
        ),
        compiler_params=pltpu.CompilerParams(**cp_kwargs),
        cost_estimate=pl.CostEstimate(flops=int(flops), transcendentals=0,
                                      bytes_accessed=int(bytes_accessed)),
    )(x2, *flat_params)

    theta = theta[:M, :theta_size].reshape(lead + (theta_size,))
    # GenericBasis: backcast = theta[..., :backcast], forecast = theta[..., -forecast:]
    return theta[..., :backcast_size], theta[..., theta_size - forecast_size:]


def _init_linear(key, out_f, in_f):
    # PyTorch nn.Linear default init: U(-1/sqrt(fan_in), 1/sqrt(fan_in))
    kw, kb = jax.random.split(key)
    bound = 1.0 / math.sqrt(in_f)
    w = jax.random.uniform(kw, (out_f, in_f), jnp.float32, -bound, bound)
    b = jax.random.uniform(kb, (out_f,), jnp.float32, -bound, bound)
    return w, b


def _reference(x, layer_params, basis_w, basis_b, backcast_size, forecast_size):
    # pure-JAX f32 reference of NBeatsBlock.forward (relu after every Linear)
    h = x
    for w, b in layer_params:
        h = jnp.maximum(h @ w.T + b, 0.0)
    theta = h @ basis_w.T + basis_b
    return theta[..., :backcast_size], theta[..., theta.shape[-1] - forecast_size:]


if __name__ == "__main__":
    # Hyper-params (small): input_size S=16, input_dim D=4, linear_layers=4,
    # layer_size=32, theta_size = backcast(16) + forecast(8).
    B, D, S = 2, 4, 16
    L = 32
    num_layers = 4
    backcast_size, forecast_size = S, 8
    theta_size = backcast_size + forecast_size

    key = jax.random.PRNGKey(0)
    keys = jax.random.split(key, num_layers + 2)

    x = jax.random.normal(keys[0], (B, D, S), jnp.float32)

    layer_params = []
    in_f = S
    for li in range(num_layers):
        w, b = _init_linear(keys[1 + li], L, in_f)
        layer_params.append((w, b))
        in_f = L
    basis_w, basis_b = _init_linear(keys[-1], theta_size, L)

    backcast, forecast = nbeats_block(
        x, layer_params, basis_w, basis_b,
        backcast_size=backcast_size, forecast_size=forecast_size)
    backcast = jax.block_until_ready(backcast)
    forecast = jax.block_until_ready(forecast)

    ref_back, ref_fore = _reference(x, layer_params, basis_w, basis_b,
                                    backcast_size, forecast_size)
    assert backcast.shape == (B, D, backcast_size)
    assert forecast.shape == (B, D, forecast_size)
    # bf16 MXU inputs -> loosened tolerance vs. the f32 reference
    assert jnp.allclose(backcast, ref_back, atol=5e-2, rtol=5e-2)
    assert jnp.allclose(forecast, ref_fore, atol=5e-2, rtol=5e-2)

    print("KERNEL_OK")
</pallas_src>

<mosaic_0001>
module attributes {stable_mosaic.version = 11 : i64} {
  func.func @_nbeats_block_kernel(%arg0: i32, %arg1: memref<16x128xbf16, #tpu.memory_space<vmem>>, %arg2: memref<128x128xbf16, #tpu.memory_space<vmem>>, %arg3: memref<1x128xf32, #tpu.memory_space<vmem>>, %arg4: memref<128x128xbf16, #tpu.memory_space<vmem>>, %arg5: memref<1x128xf32, #tpu.memory_space<vmem>>, %arg6: memref<128x128xbf16, #tpu.memory_space<vmem>>, %arg7: memref<1x128xf32, #tpu.memory_space<vmem>>, %arg8: memref<128x128xbf16, #tpu.memory_space<vmem>>, %arg9: memref<1x128xf32, #tpu.memory_space<vmem>>, %arg10: memref<128x128xbf16, #tpu.memory_space<vmem>>, %arg11: memref<1x128xf32, #tpu.memory_space<vmem>>, %arg12: memref<16x128xf32, #tpu.memory_space<vmem>>) attributes {dimension_semantics = [#tpu.dimension_semantics<parallel>], iteration_bounds = array<i64: 1>, scalar_prefetch = 0 : i64, scratch_operands = 0 : i64, tpu.core_type = #tpu.core_type<tc>, window_params = [{transform_indices = @transform_0, window_bounds = array<i64: 16, 128>}, {pipeline_mode = #tpu.pipeline_mode<synchronous>, transform_indices = @transform_1, window_bounds = array<i64: 128, 128>}, {pipeline_mode = #tpu.pipeline_mode<synchronous>, transform_indices = @transform_2, window_bounds = array<i64: 1, 128>}, {pipeline_mode = #tpu.pipeline_mode<synchronous>, transform_indices = @transform_3, window_bounds = array<i64: 128, 128>}, {pipeline_mode = #tpu.pipeline_mode<synchronous>, transform_indices = @transform_4, window_bounds = array<i64: 1, 128>}, {pipeline_mode = #tpu.pipeline_mode<synchronous>, transform_indices = @transform_5, window_bounds = array<i64: 128, 128>}, {pipeline_mode = #tpu.pipeline_mode<synchronous>, transform_indices = @transform_6, window_bounds = array<i64: 1, 128>}, {pipeline_mode = #tpu.pipeline_mode<synchronous>, transform_indices = @transform_7, window_bounds = array<i64: 128, 128>}, {pipeline_mode = #tpu.pipeline_mode<synchronous>, transform_indices = @transform_8, window_bounds = array<i64: 1, 128>}, {pipeline_mode = #tpu.pipeline_mode<synchronous>, transform_indices = @transform_9, window_bounds = array<i64: 128, 128>}, {pipeline_mode = #tpu.pipeline_mode<synchronous>, transform_indices = @transform_10, window_bounds = array<i64: 1, 128>}, {transform_indices = @transform_11, window_bounds = array<i64: 16, 128>}]} {
    %c0 = arith.constant 0 : index
    %c0_0 = arith.constant 0 : index
    %0 = vector.load %arg1[%c0, %c0_0] : memref<16x128xbf16, #tpu.memory_space<vmem>>, vector<16x128xbf16>
    %c0_1 = arith.constant 0 : index
    %c0_2 = arith.constant 0 : index
    %1 = vector.load %arg2[%c0_1, %c0_2] : memref<128x128xbf16, #tpu.memory_space<vmem>>, vector<128x128xbf16>
    %cst = arith.constant dense<0.000000e+00> : vector<16x128xf32>
    %2 = tpu.matmul %0, %1, %cst {dimension_numbers = #tpu.dot_dimension_numbers<[1], [0], [0], [1], [0, 0, 1, 1], [], []>} : vector<16x128xbf16>, vector<128x128xbf16>, vector<16x128xf32> -> vector<16x128xf32>
    %c0_3 = arith.constant 0 : index
    %c0_4 = arith.constant 0 : index
    %3 = vector.load %arg3[%c0_3, %c0_4] : memref<1x128xf32, #tpu.memory_space<vmem>>, vector<1x128xf32>
    %4 = vector.broadcast %3 : vector<1x128xf32> to vector<16x128xf32>
    %5 = arith.addf %2, %4 : vector<16x128xf32>
    %cst_5 = arith.constant 0.000000e+00 : f32
    %6 = vector.broadcast %cst_5 : f32 to vector<16x128xf32>
    %7 = arith.maximumf %5, %6 : vector<16x128xf32>
    %8 = arith.truncf %7 : vector<16x128xf32> to vector<16x128xbf16>
    %c0_6 = arith.constant 0 : index
    %c0_7 = arith.constant 0 : index
    %9 = vector.load %arg4[%c0_6, %c0_7] : memref<128x128xbf16, #tpu.memory_space<vmem>>, vector<128x128xbf16>
    %cst_8 = arith.constant dense<0.000000e+00> : vector<16x128xf32>
    %10 = tpu.matmul %8, %9, %cst_8 {dimension_numbers = #tpu.dot_dimension_numbers<[1], [0], [0], [1], [0, 0, 1, 1], [], []>} : vector<16x128xbf16>, vector<128x128xbf16>, vector<16x128xf32> -> vector<16x128xf32>
    %c0_9 = arith.constant 0 : index
    %c0_10 = arith.constant 0 : index
    %11 = vector.load %arg5[%c0_9, %c0_10] : memref<1x128xf32, #tpu.memory_space<vmem>>, vector<1x128xf32>
    %12 = vector.broadcast %11 : vector<1x128xf32> to vector<16x128xf32>
    %13 = arith.addf %10, %12 : vector<16x128xf32>
    %cst_11 = arith.constant 0.000000e+00 : f32
    %14 = vector.broadcast %cst_11 : f32 to vector<16x128xf32>
    %15 = arith.maximumf %13, %14 : vector<16x128xf32>
    %16 = arith.truncf %15 : vector<16x128xf32> to vector<16x128xbf16>
    %c0_12 = arith.constant 0 : index
    %c0_13 = arith.constant 0 : index
    %17 = vector.load %arg6[%c0_12, %c0_13] : memref<128x128xbf16, #tpu.memory_space<vmem>>, vector<128x128xbf16>
    %cst_14 = arith.constant dense<0.000000e+00> : vector<16x128xf32>
    %18 = tpu.matmul %16, %17, %cst_14 {dimension_numbers = #tpu.dot_dimension_numbers<[1], [0], [0], [1], [0, 0, 1, 1], [], []>} : vector<16x128xbf16>, vector<128x128xbf16>, vector<16x128xf32> -> vector<16x128xf32>
    %c0_15 = arith.constant 0 : index
    %c0_16 = arith.constant 0 : index
    %19 = vector.load %arg7[%c0_15, %c0_16] : memref<1x128xf32, #tpu.memory_space<vmem>>, vector<1x128xf32>
    %20 = vector.broadcast %19 : vector<1x128xf32> to vector<16x128xf32>
    %21 = arith.addf %18, %20 : vector<16x128xf32>
    %cst_17 = arith.constant 0.000000e+00 : f32
    %22 = vector.broadcast %cst_17 : f32 to vector<16x128xf32>
    %23 = arith.maximumf %21, %22 : vector<16x128xf32>
    %24 = arith.truncf %23 : vector<16x128xf32> to vector<16x128xbf16>
    %c0_18 = arith.constant 0 : index
    %c0_19 = arith.constant 0 : index
    %25 = vector.load %arg8[%c0_18, %c0_19] : memref<128x128xbf16, #tpu.memory_space<vmem>>, vector<128x128xbf16>
    %cst_20 = arith.constant dense<0.000000e+00> : vector<16x128xf32>
    %26 = tpu.matmul %24, %25, %cst_20 {dimension_numbers = #tpu.dot_dimension_numbers<[1], [0], [0], [1], [0, 0, 1, 1], [], []>} : vector<16x128xbf16>, vector<128x128xbf16>, vector<16x128xf32> -> vector<16x128xf32>
    %c0_21 = arith.constant 0 : index
    %c0_22 = arith.constant 0 : index
    %27 = vector.load %arg9[%c0_21, %c0_22] : memref<1x128xf32, #tpu.memory_space<vmem>>, vector<1x128xf32>
    %28 = vector.broadcast %27 : vector<1x128xf32> to vector<16x128xf32>
    %29 = arith.addf %26, %28 : vector<16x128xf32>
    %cst_23 = arith.constant 0.000000e+00 : f32
    %30 = vector.broadcast %cst_23 : f32 to vector<16x128xf32>
    %31 = arith.maximumf %29, %30 : vector<16x128xf32>
    %32 = arith.truncf %31 : vector<16x128xf32> to vector<16x128xbf16>
    %c0_24 = arith.constant 0 : index
    %c0_25 = arith.constant 0 : index
    %33 = vector.load %arg10[%c0_24, %c0_25] : memref<128x128xbf16, #tpu.memory_space<vmem>>, vector<128x128xbf16>
    %cst_26 = arith.constant dense<0.000000e+00> : vector<16x128xf32>
    %34 = tpu.matmul %32, %33, %cst_26 {dimension_numbers = #tpu.dot_dimension_numbers<[1], [0], [0], [1], [0, 0, 1, 1], [], []>} : vector<16x128xbf16>, vector<128x128xbf16>, vector<16x128xf32> -> vector<16x128xf32>
    %c0_27 = arith.constant 0 : index
    %c0_28 = arith.constant 0 : index
    %35 = vector.load %arg11[%c0_27, %c0_28] : memref<1x128xf32, #tpu.memory_space<vmem>>, vector<1x128xf32>
    %36 = vector.broadcast %35 : vector<1x128xf32> to vector<16x128xf32>
    %37 = arith.addf %34, %36 : vector<16x128xf32>
    %c0_29 = arith.constant 0 : index
    %c0_30 = arith.constant 0 : index
    %38 = vector.load %arg12[%c0_29, %c0_30] : memref<16x128xf32, #tpu.memory_space<vmem>>, vector<16x128xf32>
    tpu.vector_store %arg12[%c0_29, %c0_30], %37 {strides = array<i32>} : memref<16x128xf32, #tpu.memory_space<vmem>>, vector<16x128xf32>,
    return
  }
  func.func @transform_0(%arg0: i32) -> (i32, i32) {
    %c0_i32 = arith.constant 0 : i32
    %c0_i32_0 = arith.constant 0 : i32
    return %arg0, %c0_i32 : i32, i32
  }
  func.func @transform_1(%arg0: i32) -> (i32, i32) {
    %c0_i32 = arith.constant 0 : i32
    %c0_i32_0 = arith.constant 0 : i32
    %c0_i32_1 = arith.constant 0 : i32
    return %c0_i32, %c0_i32_0 : i32, i32
  }
  func.func @transform_2(%arg0: i32) -> (i32, i32) {
    %c0_i32 = arith.constant 0 : i32
    %c0_i32_0 = arith.constant 0 : i32
    %c0_i32_1 = arith.constant 0 : i32
    return %c0_i32, %c0_i32_0 : i32, i32
  }
  func.func @transform_3(%arg0: i32) -> (i32, i32) {
    %c0_i32 = arith.constant 0 : i32
    %c0_i32_0 = arith.constant 0 : i32
    %c0_i32_1 = arith.constant 0 : i32
    return %c0_i32, %c0_i32_0 : i32, i32
  }
  func.func @transform_4(%arg0: i32) -> (i32, i32) {
    %c0_i32 = arith.constant 0 : i32
    %c0_i32_0 = arith.constant 0 : i32
    %c0_i32_1 = arith.constant 0 : i32
    return %c0_i32, %c0_i32_0 : i32, i32
  }
  func.func @transform_5(%arg0: i32) -> (i32, i32) {
    %c0_i32 = arith.constant 0 : i32
    %c0_i32_0 = arith.constant 0 : i32
    %c0_i32_1 = arith.constant 0 : i32
    return %c0_i32, %c0_i32_0 : i32, i32
  }
  func.func @transform_6(%arg0: i32) -> (i32, i32) {
    %c0_i32 = arith.constant 0 : i32
    %c0_i32_0 = arith.constant 0 : i32
    %c0_i32_1 = arith.constant 0 : i32
    return %c0_i32, %c0_i32_0 : i32, i32
  }
  func.func @transform_7(%arg0: i32) -> (i32, i32) {
    %c0_i32 = arith.constant 0 : i32
    %c0_i32_0 = arith.constant 0 : i32
    %c0_i32_1 = arith.constant 0 : i32
    return %c0_i32, %c0_i32_0 : i32, i32
  }
  func.func @transform_8(%arg0: i32) -> (i32, i32) {
    %c0_i32 = arith.constant 0 : i32
    %c0_i32_0 = arith.constant 0 : i32
    %c0_i32_1 = arith.constant 0 : i32
    return %c0_i32, %c0_i32_0 : i32, i32
  }
  func.func @transform_9(%arg0: i32) -> (i32, i32) {
    %c0_i32 = arith.constant 0 : i32
    %c0_i32_0 = arith.constant 0 : i32
    %c0_i32_1 = arith.constant 0 : i32
    return %c0_i32, %c0_i32_0 : i32, i32
  }
  func.func @transform_10(%arg0: i32) -> (i32, i32) {
    %c0_i32 = arith.constant 0 : i32
    %c0_i32_0 = arith.constant 0 : i32
    %c0_i32_1 = arith.constant 0 : i32
    return %c0_i32, %c0_i32_0 : i32, i32
  }
  func.func @transform_11(%arg0: i32) -> (i32, i32) {
    %c0_i32 = arith.constant 0 : i32
    %c0_i32_0 = arith.constant 0 : i32
    return %arg0, %c0_i32 : i32, i32
  }
}

</mosaic_0001>

<bundles_post_ra>
// kernel: tpu_custom_call.1
= control target key start
LH: loop header
LB: loop body
LE: loop exit
PB: predicated region body
PF: predicated region fallthrough
CT: control target
= control target key end

     0   :  { %16 = vsyncpa [#allocation3], 0  ;;  %s1111_s0 = inlined_call_operand.hbm [shape: bf16[16,128], index: 0, kind: input, shape index: {}]   ;;  %s1112_s1 = inlined_call_operand.hbm [shape: bf16[128,128], index: 1, kind: input, shape index: {}]   ;;  %s1113_s2 = inlined_call_operand.vmem [shape: f32[1,128], index: 2, kind: input, shape index: {}]   ;;  %s1114_s3 = inlined_call_operand.hbm [shape: bf16[128,128], index: 3, kind: input, shape index: {}]   ;;  %s1115_s4 = inlined_call_operand.vmem [shape: f32[1,128], index: 4, kind: input, shape index: {}]   ;;  %s1116_s5 = inlined_call_operand.hbm [shape: bf16[128,128], index: 5, kind: input, shape index: {}]   ;;  %s1117_s6 = inlined_call_operand.vmem [shape: f32[1,128], index: 6, kind: input, shape index: {}]   ;;  %s1118_s7 = inlined_call_operand.hbm [shape: bf16[128,128], index: 7, kind: input, shape index: {}]   ;;  %s1119_s8 = inlined_call_operand.vmem [shape: f32[1,128], index: 8, kind: input, shape index: {}]   ;;  %s1120_s9 = inlined_call_operand.hbm [shape: bf16[128,128], index: 9, kind: input, shape index: {}]   ;;  %s1121_s10 = inlined_call_operand.vmem [shape: f32[1,128], index: 10, kind: input, shape index: {}]   ;;  %s1122_s11 = inlined_call_operand.hbm [shape: f32[16,128], index: 11, kind: output, shape index: {}]  }
   0x1   :  { %17 = vsyncpa [#allocation6], 0 }
   0x2   :  { %18 = vsyncpa [#allocation9], 0 }
   0x3   :  { %19 = vsyncpa [#allocation12], 0 }
   0x4   :  { %20 = vsyncpa [#allocation4], 0  ;;  %s38_s19 = sshll.u32 %s1112_s1, 4  ;;  %s986_s20 = smov [#allocation5]   ;;  %s39_s19 = int_to_ptr.hbm [resolvable:$true] %s38_s19 }
   0x5   :  { %s40_s21 = sshll.u32 %s986_s20, 4  ;;  %s68_s24 = sshll.u32 %s1116_s5, 4  ;;  %s41_s21 = int_to_ptr.vmem [resolvable:$true] %s40_s21  ;;  %s69_s24 = int_to_ptr.hbm [resolvable:$true] %s68_s24 }
   0x6   :  { %s987_s25 = smov 64   ;;  %s988_s26 = smov 4  }
   0x7   :  { %46 = dma.hbm_to_vmem [thread:$0]  %s39_s19, 1024, %s41_s21, [#allocation6], %s987_s25, %s987_s25, %s988_s26  }
   0x8   :  { %s989_s27 = smov [#allocation8]   ;;  %s25_s1 = sshll.u32 %s1111_s0, 4  ;;  %s26_s1 = int_to_ptr.hbm [resolvable:$true] %s25_s1 }
   0x9   :  { %s70_s28 = sshll.u32 %s989_s27, 4  ;;  %s53_s13 = sshll.u32 %s1114_s3, 4  ;;  %s71_s28 = int_to_ptr.vmem [resolvable:$true] %s70_s28  ;;  %s54_s13 = int_to_ptr.hbm [resolvable:$true] %s53_s13 }
   0xa   :  { %76 = dma.hbm_to_vmem [thread:$0]  %s69_s24, 1024, %s71_s28, [#allocation9], %s987_s25, %s987_s25, %s988_s26  }
   0xb   :  { %s990_s14 = smov [#allocation2]   ;;  %s991_s16 = smov [#allocation7]  }
   0xc   :  { %s27_s15 = sshll.u32 %s990_s14, 4  ;;  %s55_s0 = sshll.u32 %s991_s16, 4  ;;  %s28_s15 = int_to_ptr.vmem [resolvable:$true] %s27_s15  ;;  %s56_s0 = int_to_ptr.vmem [resolvable:$true] %s55_s0 }
   0xd   :  { %33 = dma.hbm_to_vmem [thread:$0]  %s26_s1, 128, %s28_s15, [#allocation3], %s987_s25, %s987_s25, %s988_s26  }
   0xe   :  { %s83_s19 = sshll.u32 %s1118_s7, 4  ;;  %s98_s21 = sshll.u32 %s1120_s9, 4  ;;  %s84_s19 = int_to_ptr.hbm [resolvable:$true] %s83_s19  ;;  %s99_s21 = int_to_ptr.hbm [resolvable:$true] %s98_s21 }
   0xf   :  { %61 = dma.hbm_to_vmem [thread:$0]  %s54_s13, 1024, %s56_s0, [#allocation6], %s987_s25, %s987_s25, %s988_s26  }
  0x10   :  { %s992_s22 = smov [#allocation10]   ;;  %s993_s24 = smov [#allocation11]  }
  0x11   :  { %s85_s23 = sshll.u32 %s992_s22, 4  ;;  %s100_s7 = sshll.u32 %s993_s24, 4  ;;  %s86_s23 = int_to_ptr.vmem [resolvable:$true] %s85_s23  ;;  %s101_s7 = int_to_ptr.vmem [resolvable:$true] %s100_s7 }
  0x12   :  { %91 = dma.hbm_to_vmem [thread:$0]  %s84_s19, 1024, %s86_s23, [#allocation9], %s987_s25, %s987_s25, %s988_s26  }
  0x13   :  { %106 = dma.hbm_to_vmem [thread:$0]  %s99_s21, 1024, %s101_s7, [#allocation12], %s987_s25, %s987_s25, %s988_s26  }
  0x14   :  { %976 = dma.done.wait [#allocation3], 128  }
  0x15   :  { %977 = vsyncadd [#allocation3], 4294967168 }
  0x16   :  { %978 = dma.done.wait [#allocation6], 2048  }
  0x17   :  { %979 = vsyncadd [#allocation6], 4294965248 }
  0x18   :  { %980 = dma.done.wait [#allocation9], 2048  }
  0x19   :  { %981 = vsyncadd [#allocation9], 4294965248 }
  0x1a   :  { %982 = dma.done.wait [#allocation12], 1024  }
  0x1b   :  { %983 = vsyncadd [#allocation12], 4294966272  ;;  %v759_v0 = vld [vmem:[#allocation5 + $0x38] sm:$0xff]  ;;  %v758_v1 = vld [vmem:[#allocation5 + $0x30] sm:$0xff]  ;;  %s994_s1 = smov [#allocation13]   ;;  %s995_s14 = smov 128  }
  0x1c   :  { %209 = vmatpush.bf16.msra.mxu0 %v759_v0  ;;  %v767_v2 = vld [vmem:[#allocation7 + $0x38] sm:$0xff]  ;;  %v766_v3 = vld [vmem:[#allocation7 + $0x30] sm:$0xff]  ;;  %v757_v4 = vld [vmem:[#allocation5 + $0x28] sm:$0xff]  ;;  %s569_s5 = sshll.u32 %s994_s1, 4  ;;  %s996_s15 = smov 8   ;;  %s570_s5 = int_to_ptr.vmem [resolvable:$true] %s569_s5 }
  0x1d   :  { %294 = vmatpush.bf16.msra.mxu1 %v767_v2  ;;  %v765_v5 = vld [vmem:[#allocation7 + $0x28] sm:$0xff]  ;;  %v756_v6 = vld [vmem:[#allocation5 + $0x20] sm:$0xff]  ;;  %v755_v8 = vld [vmem:[#allocation5 + $0x18] sm:$0xff] }
  0x1e   :  { %v764_v7 = vld [vmem:[#allocation7 + $0x20] sm:$0xff]  ;;  %v754_v9 = vld [vmem:[#allocation5 + $0x10] sm:$0xff]  ;;  %v753_v10 = vld [vmem:[#allocation5 + $0x8] sm:$0xff] }
  0x1f   :  { %v752_v11 = vld [vmem:[#allocation5] sm:$0xff]  ;;  %v751_v12 = vld [vmem:[#allocation2] sm:$0xff]  ;;  %v762_v14 = vld [vmem:[#allocation7 + $0x10] sm:$0xff] }
  0x20   :  { %210 = vmatpush.bf16.msra.mxu0 %v758_v1  ;;  %v763_v13 = vld [vmem:[#allocation7 + $0x18] sm:$0xff]  ;;  %v761_v15 = vld [vmem:[#allocation7 + $0x8] sm:$0xff]  ;;  %v760_v16 = vld [vmem:[#allocation7] sm:$0xff] }
  0x21   :  { %295 = vmatpush.bf16.msra.mxu1 %v766_v3  ;;  %v775_v17 = vld [vmem:[#allocation8 + $0x38] sm:$0xff]  ;;  %v774_v18 = vld [vmem:[#allocation8 + $0x30] sm:$0xff]  ;;  %v773_v19 = vld [vmem:[#allocation8 + $0x28] sm:$0xff] }
  0x22   :  { %379 = vmatpush.bf16.msra.mxu2 %v775_v17  ;;  %v772_v20 = vld [vmem:[#allocation8 + $0x20] sm:$0xff]  ;;  %v803_v22 = vld [vmem:[%s1113_s2] ss:$0 sm:$0xff]  ;;  %v770_v30 = vld [vmem:[#allocation8 + $0x10] sm:$0xff] }
  0x23   :  { %v771_v29 = vld [vmem:[#allocation8 + $0x18] sm:$0xff]  ;;  %v769_v31 = vld [vmem:[#allocation8 + $0x8] sm:$0xff]  ;;  %v768_v32 = vld [vmem:[#allocation8] sm:$0xff] }
  0x24   :  { %211 = vmatpush.bf16.msra.mxu0 %v757_v4  ;;  %v783_v33 = vld [vmem:[#allocation10 + $0x38] sm:$0xff]  ;;  %v782_v34 = vld [vmem:[#allocation10 + $0x30] sm:$0xff]  ;;  %v781_v35 = vld [vmem:[#allocation10 + $0x28] sm:$0xff] }
  0x25   :  { %296 = vmatpush.bf16.msra.mxu1 %v765_v5  ;;  %464 = vmatpush.bf16.msra.mxu3 %v783_v33  ;;  %v780_v36 = vld [vmem:[#allocation10 + $0x20] sm:$0xff]  ;;  %v804_v38 = vld [vmem:[%s1115_s4] ss:$0 sm:$0xff]  ;;  %v778_v46 = vld [vmem:[#allocation10 + $0x10] sm:$0xff] }
  0x26   :  { %380 = vmatpush.bf16.msra.mxu2 %v774_v18  ;;  %v779_v45 = vld [vmem:[#allocation10 + $0x18] sm:$0xff]  ;;  %v777_v47 = vld [vmem:[#allocation10 + $0x8] sm:$0xff]  ;;  %v776_v48 = vld [vmem:[#allocation10] sm:$0xff] }
  0x27   :  { %v791_v49 = vld [vmem:[#allocation11 + $0x38] sm:$0xff]  ;;  %v790_v50 = vld [vmem:[#allocation11 + $0x30] sm:$0xff]  ;;  %v789_v51 = vld [vmem:[#allocation11 + $0x28] sm:$0xff] }
  0x28   :  { %212 = vmatpush.bf16.msra.mxu0 %v756_v6  ;;  %v788_v52 = vld [vmem:[#allocation11 + $0x20] sm:$0xff]  ;;  %v805_v54 = vld [vmem:[%s1117_s6] ss:$0 sm:$0xff]  ;;  %v786_v62 = vld [vmem:[#allocation11 + $0x10] sm:$0xff] }
  0x29   :  { %297 = vmatpush.bf16.msra.mxu1 %v764_v7  ;;  %465 = vmatpush.bf16.msra.mxu3 %v782_v34  ;;  %v787_v61 = vld [vmem:[#allocation11 + $0x18] sm:$0xff]  ;;  %v785_v63 = vld [vmem:[#allocation11 + $0x8] sm:$0xff]  ;;  %v784_v0 = vld [vmem:[#allocation11] sm:$0xff] }
  0x2a   :  { %381 = vmatpush.bf16.msra.mxu2 %v773_v19  ;;  %v806_v2 = vld [vmem:[%s1119_s8] ss:$0 sm:$0xff]  ;;  %s571_s8 = sshll.u32 %s1122_s11, 4  ;;  %s572_s8 = int_to_ptr.hbm [resolvable:$true] %s571_s8 }
  0x2c   :  { %213 = vmatpush.bf16.msra.mxu0 %v755_v8 }
  0x2d   :  { %298 = vmatpush.bf16.msra.mxu1 %v763_v13  ;;  %466 = vmatpush.bf16.msra.mxu3 %v781_v35 }
  0x2e   :  { %382 = vmatpush.bf16.msra.mxu2 %v772_v20 }
  0x30   :  { %214 = vmatpush.bf16.msra.mxu0 %v754_v9  ;;  %v807_v9 = vld [vmem:[%s1121_s10] ss:$0 sm:$0xff] }
  0x31   :  { %299 = vmatpush.bf16.msra.mxu1 %v762_v14  ;;  %467 = vmatpush.bf16.msra.mxu3 %v780_v36 }
  0x32   :  { %383 = vmatpush.bf16.msra.mxu2 %v771_v29 }
  0x34   :  { %215 = vmatpush.bf16.msra.mxu0 %v753_v10 }
  0x35   :  { %300 = vmatpush.bf16.msra.mxu1 %v761_v15  ;;  %468 = vmatpush.bf16.msra.mxu3 %v779_v45 }
  0x36   :  { %384 = vmatpush.bf16.msra.mxu2 %v770_v30 }
  0x38   :  { %216 = vmatpush.bf16.msra.mxu0 %v752_v11 }
  0x39   :  { %301 = vmatpush.bf16.msra.mxu1 %v760_v16  ;;  %469 = vmatpush.bf16.msra.mxu3 %v778_v46 }
  0x3a   :  { %385 = vmatpush.bf16.msra.mxu2 %v769_v31 }
  0x3b   :  { %217 = vmatmul.bf16.vlgmr.msra.gmra.mxu0 %v751_v12 }
  0x3c   :  { %549 = vmatpush.bf16.msrb.mxu0 %v791_v49 }
  0x3d   :  { %470 = vmatpush.bf16.msra.mxu3 %v777_v47 }
  0x3e   :  { %386 = vmatpush.bf16.msra.mxu2 %v768_v32 }
  0x40   :  { %550 = vmatpush.bf16.msrb.mxu0 %v790_v50 }
  0x41   :  { %471 = vmatpush.bf16.msra.mxu3 %v776_v48 }
  0x44   :  { %551 = vmatpush.bf16.msrb.mxu0 %v789_v51 }
  0x48   :  { %552 = vmatpush.bf16.msrb.mxu0 %v788_v52 }
  0x4c   :  { %553 = vmatpush.bf16.msrb.mxu0 %v787_v61 }
  0x50   :  { %554 = vmatpush.bf16.msrb.mxu0 %v786_v62 }
  0x54   :  { %555 = vmatpush.bf16.msrb.mxu0 %v785_v63 }
  0x58   :  { %556 = vmatpush.bf16.msrb.mxu0 %v784_v0 }
  0xb8   :  { %v218_v21 = vpop.f32.mrf.mxu0 }
  0xb9   :  { %v219_v23 = vadd.f32 %v803_v22, %v218_v21 }
  0xbb   :  { %v223_v26 = vmax.f32 %v219_v23, 0.0 }
  0xc0   :  { %v220_v24 = vpop.f32.mrf.mxu0 }
  0xc1   :  { %v221_v25 = vadd.f32 %v803_v22, %v220_v24 }
  0xc3   :  { %v224_v27 = vmax.f32 %v221_v25, 0.0 }
  0xc5   :  { %v225_v28 = vpack.c.bf16 %v224_v27, %v223_v26 }
  0xc7   :  { %302 = vmatmul.bf16.vlgmr.msra.gmra.mxu1 %v225_v28 }
 0x144   :  { %v303_v37 = vpop.f32.mrf.mxu1 }
 0x145   :  { %v304_v39 = vadd.f32 %v804_v38, %v303_v37 }
 0x147   :  { %v308_v42 = vmax.f32 %v304_v39, 0.0 }
 0x14c   :  { %v305_v40 = vpop.f32.mrf.mxu1 }
 0x14d   :  { %v306_v41 = vadd.f32 %v804_v38, %v305_v40 }
 0x14f   :  { %v309_v43 = vmax.f32 %v306_v41, 0.0 }
 0x151   :  { %v310_v44 = vpack.c.bf16 %v309_v43, %v308_v42 }
 0x153   :  { %387 = vmatmul.bf16.vlgmr.msra.gmra.mxu2 %v310_v44 }
 0x1d6   :  { %v388_v53 = vpop.f32.mrf.mxu2 }
 0x1d7   :  { %v389_v55 = vadd.f32 %v805_v54, %v388_v53 }
 0x1d9   :  { %v393_v58 = vmax.f32 %v389_v55, 0.0 }
 0x1de   :  { %v390_v56 = vpop.f32.mrf.mxu2 }
 0x1df   :  { %v391_v57 = vadd.f32 %v805_v54, %v390_v56 }
 0x1e1   :  { %v394_v59 = vmax.f32 %v391_v57, 0.0 }
 0x1e3   :  { %v395_v60 = vpack.c.bf16 %v394_v59, %v393_v58 }
 0x1e5   :  { %472 = vmatmul.bf16.vlgmr.msra.gmra.mxu3 %v395_v60 }
 0x268   :  { %v473_v1 = vpop.f32.mrf.mxu3 }
 0x269   :  { %v474_v3 = vadd.f32 %v806_v2, %v473_v1 }
 0x26b   :  { %v478_v6 = vmax.f32 %v474_v3, 0.0 }
 0x270   :  { %v475_v4 = vpop.f32.mrf.mxu3 }
 0x271   :  { %v476_v5 = vadd.f32 %v806_v2, %v475_v4 }
 0x273   :  { %v479_v7 = vmax.f32 %v476_v5, 0.0 }
 0x275   :  { %v480_v8 = vpack.c.bf16 %v479_v7, %v478_v6 }
 0x277   :  { %557 = vmatmul.bf16.vlgmr.msrb.gmra.mxu0 %v480_v8 }
 0x2f4   :  { %v558_v10 = vpop.f32.mrf.mxu0 }
 0x2f5   :  { %v559_v11 = vadd.f32 %v807_v9, %v558_v10 }
 0x2f7   :  { %563 = vst [vmem:[#allocation13] sm:$0xff] %v559_v11 }
 0x2fc   :  { %v560_v12 = vpop.f32.mrf.mxu0 }
 0x2fd   :  { %v561_v13 = vadd.f32 %v807_v9, %v560_v12 }
 0x2ff   :  { %564 = vst [vmem:[#allocation13 + $0x8] sm:$0xff] %v561_v13 }
 0x300   :  { %577 = dma.vmem_to_hbm [thread:$0]  %s570_s5, 256, %s572_s8, [#allocation4], %s995_s14, %s995_s14, %s996_s15  }
 0x301   :  { %984 = dma.done.wait [#allocation4], 256  }
 0x302   :  { %985 = vsyncadd [#allocation4], 4294967040 }
 0x303   :  { %582 = vsyncpa [#allocation3], 1 }
 0x304   :  { %583 = vsyncpa [#allocation6], 1 }
 0x305   :  { %584 = vsyncpa [#allocation9], 1 }
 0x306   :  { %585 = vsyncpa [#allocation12], 1 }
 0x307   :  { %586 = vsyncpa [#allocation4], 1 }

</bundles_post_ra>
